<compile_context>
chip_gen: v5e
topology: v5e:2x2
jax: 0.10.0
libtpu: 0.0.40
codegen_flags: <defaults>
</compile_context>

<pallas_src>
import math
import functools

import numpy as np
import jax
import jax.numpy as jnp
from jax.experimental import pallas as pl
from jax.experimental.pallas import tpu as pltpu


def _round_up(x, m):
    return ((x + m - 1) // m) * m


# -----------------------------------------------------------------------------
# Hardware-aware knobs
# -----------------------------------------------------------------------------
def _device_kind():
    try:
        return jax.devices()[0].device_kind.lower()
    except Exception:
        return ""


def _is_v7x(kind):
    return ("v7" in kind) or ("7x" in kind)


def _vmem_limit_bytes(kind):
    cap = None
    try:
        info = pltpu.get_tpu_info()
        cap = int(getattr(info, "vmem_capacity_bytes", 0)) or None
    except Exception:
        cap = None
    if cap is None:
        # v7x: 64 MiB per TensorCore; v5e/v6e: 128 MiB.
        cap = (64 if _is_v7x(kind) else 128) * 1024 * 1024
    # Leave ~20% headroom for compiler-managed internal scratch (the (tm, th)
    # f32 hidden intermediate + its bf16 copy) and pipeline bookkeeping.
    # TODO(synk): also bump internal_scratch_in_bytes when tm*th is very large.
    return int(cap * 0.8)


def _epilogue_dtype(kind):
    # v6e / v7x have bf16 VALU + EUP -> run the bias1+GELU epilogue in packed
    # bf16 (2x elementwise/transcendental throughput).  v5e / unknown chips
    # keep the f32 path (no bf16 VPU/EUP on v5e).
    if ("v6" in kind) or _is_v7x(kind):
        return jnp.bfloat16
    return jnp.float32


_SINGLE_BUFFER_OK = None


def _single_buffer_supported():
    """Probe once whether pipeline_mode=pl.Buffered(1) compiles on this jax/TPU."""
    global _SINGLE_BUFFER_OK
    if _SINGLE_BUFFER_OK is None:
        def _k(x_ref, o_ref):
            o_ref[...] = x_ref[...]
        try:
            spec = pl.BlockSpec((8, 128), lambda i: (0, 0),
                                pipeline_mode=pl.Buffered(1))
            out = pl.pallas_call(
                _k,
                out_shape=jax.ShapeDtypeStruct((8, 128), jnp.float32),
                grid=(1,),
                in_specs=[spec],
                out_specs=pl.BlockSpec((8, 128), lambda i: (0, 0)),
            )(jnp.zeros((8, 128), jnp.float32))
            jax.block_until_ready(out)
            _SINGLE_BUFFER_OK = True
        except Exception:
            _SINGLE_BUFFER_OK = False
    return _SINGLE_BUFFER_OK


# -----------------------------------------------------------------------------
# In-kernel math
# -----------------------------------------------------------------------------
def _erf_approx(x):
    """Abramowitz & Stegun 7.1.26 rational approximation of erf.

    Uses only mul/add + exp + (approx) reciprocal -> VPU + EUP.  Runs in the
    dtype of `x` (f32 on v5e, bf16 on v6e/v7x).
    """
    a1 = 0.254829592
    a2 = -0.284496736
    a3 = 1.421413741
    a4 = -1.453152027
    a5 = 1.061405429
    p = 0.3275911
    sign = jnp.where(x >= 0.0, 1.0, -1.0).astype(x.dtype)
    z = jnp.abs(x)
    denom = 1.0 + p * z
    if hasattr(pl, "reciprocal"):
        # approx vrcp runs in the EUP slot -> removes ~4-6 VALU ops / element.
        t = pl.reciprocal(denom.astype(jnp.float32), approx=True).astype(x.dtype)
    else:
        t = 1.0 / denom
    poly = ((((a5 * t + a4) * t + a3) * t + a2) * t + a1) * t
    y = 1.0 - poly * jnp.exp(-z * z)
    return sign * y


def _gelu_exact(x):
    # Exact (erf-based) GELU, matching PyTorch's default nn.GELU().
    return 0.5 * x * (1.0 + _erf_approx(x * 0.7071067811865476))


# -----------------------------------------------------------------------------
# Fused MLP kernel: out = GELU(x @ W1 + b1) @ W2 + b2
# Grid: (row tiles ["parallel"], hidden tiles ["arbitrary" reduction]).
# -----------------------------------------------------------------------------
def _mlp_kernel(x_ref, w1_ref, b1_ref, w2_ref, b2_ref, o_ref, acc_ref, *,
                epi_dtype):
    h_idx = pl.program_id(1)

    @pl.when(h_idx == 0)
    def _init():
        acc_ref[...] = jnp.zeros_like(acc_ref)

    # Cast the activation tile to bf16 in-kernel (x stays f32 in HBM).
    xb = x_ref[...].astype(jnp.bfloat16)
    h = jnp.dot(xb, w1_ref[...], preferred_element_type=jnp.float32)
    h = (h + b1_ref[...]).astype(epi_dtype)        # bias1 add in f32, then GELU
    h = _gelu_exact(h)                              # bf16 on v6e/v7x, f32 on v5e
    acc_ref[...] += jnp.dot(h.astype(jnp.bfloat16), w2_ref[...],
                            preferred_element_type=jnp.float32)

    @pl.when(h_idx == pl.num_programs(1) - 1)
    def _finalize():
        o_ref[...] = (acc_ref[...] + b2_ref[...]).astype(o_ref.dtype)


# -----------------------------------------------------------------------------
# Tiling heuristics
# -----------------------------------------------------------------------------
def _pick_tm(m, cap, want_even_steps):
    """Row-tile size: multiple of 8, <= cap, >= 2 grid steps when possible."""
    if m <= 8:
        return m
    tm = min(cap, _round_up(m, 8))
    steps = pl.cdiv(m, tm)
    if steps < 2:
        tm = max(8, _round_up(pl.cdiv(m, 2), 8))
        steps = pl.cdiv(m, tm)
    if want_even_steps and steps > 1 and steps % 2 == 1:
        # v7x megacore: keep both TensorCores equally loaded.
        tm2 = max(8, _round_up(pl.cdiv(m, steps + 1), 8))
        if pl.cdiv(m, tm2) % 2 == 0:
            tm = tm2
    return tm


def _pick_th(hid, din, dout, tm, budget, out_bytes):
    """Hidden-tile size: full H if it fits single-buffered, else the largest
    multiple-of-128 divisor of H (<= 2048) whose double-buffered W1/W2 slices
    fit the VMEM budget."""
    def fits(th, nbuf):
        fixed = (2 * tm * din * 4                 # double-buffered x tile (f32)
                 + 2 * tm * dout * out_bytes      # double-buffered out tile
                 + tm * dout * 4                  # f32 accumulator scratch
                 + 8 * dout * 4)                  # b2 (sublane-padded)
        per = (nbuf * (din * th + th * dout) * 2  # W1/W2 slices (bf16)
               + nbuf * 8 * th * 4                # b1 slice (sublane-padded)
               + tm * th * 6)                     # hidden f32 + bf16 intermediate
        return fixed + per <= budget

    if fits(hid, 1):
        return hid
    best = None
    hi = min((hid // 128) * 128, 2048)
    for cand in range(128, hi + 1, 128):
        if hid % cand == 0 and fits(cand, 2):
            best = cand
    if best is not None:
        return best
    # TODO(synk): tile Din/Dout as well (with in-kernel masking) when even a
    # 128-wide hidden slice does not fit VMEM.
    return hid


# -----------------------------------------------------------------------------
# Wrapper
# -----------------------------------------------------------------------------
def mlp_forward(x, w1, b1, w2, b2, *, out_dtype=None, max_th=None):
    """Fused Mlp forward: GELU(x @ w1 + b1) @ w2 + b2  (dropout p=0 == identity).

    x: (..., Din) float32 (cast to bf16 inside the kernel).
    w1: (Din, H), w2: (H, Dout) — ideally already stored as bf16 by the caller
    (cast once at init, not per call).  b1: (H,), b2: (Dout,).
    """
    orig_shape = x.shape
    din = orig_shape[-1]
    m = int(np.prod(orig_shape[:-1]))
    hid, dout = w1.shape[1], w2.shape[1]
    assert w1.shape[0] == din and w2.shape[0] == hid
    out_dtype = out_dtype or x.dtype

    kind = _device_kind()
    epi_dtype = _epilogue_dtype(kind)
    vmem_limit = _vmem_limit_bytes(kind)

    # Weights should already be bf16 (host them as bf16 once, outside the
    # per-call path); cast here only as a fallback.
    if w1.dtype != jnp.bfloat16:
        w1 = w1.astype(jnp.bfloat16)
    if w2.dtype != jnp.bfloat16:
        w2 = w2.astype(jnp.bfloat16)
    b1f = b1.reshape(1, hid).astype(jnp.float32)
    b2f = b2.reshape(1, dout).astype(jnp.float32)
    x2 = x.reshape(m, din)                 # metadata-only; dtype untouched

    tm = _pick_tm(m, cap=(256 if _is_v7x(kind) else 512),
                  want_even_steps=_is_v7x(kind))
    out_bytes = jnp.dtype(out_dtype).itemsize
    th = _pick_th(hid, din, dout, tm, budget=int(vmem_limit * 0.75),
                  out_bytes=out_bytes)
    if max_th is not None:
        th_cap = max(128, (min(th, max_th) // 128) * 128)
        th = th_cap if hid % th_cap == 0 else hid

    num_m = pl.cdiv(m, tm)
    num_h = pl.cdiv(hid, th)
    weights_resident = (num_h == 1)
    sb_ok = _single_buffer_supported()

    def spec(shape, index_map, single_buffer=False):
        if single_buffer and sb_ok:
            # Grid-invariant operand: one pipeline buffer halves its VMEM cost.
            try:
                return pl.BlockSpec(shape, index_map,
                                    pipeline_mode=pl.Buffered(1))
            except Exception:
                pass
        return pl.BlockSpec(shape, index_map)

    out = pl.pallas_call(
        functools.partial(_mlp_kernel, epi_dtype=epi_dtype),
        out_shape=jax.ShapeDtypeStruct((m, dout), out_dtype),
        grid=(num_m, num_h),
        in_specs=[
            spec((tm, din), lambda i, h: (i, 0)),                              # x rows
            spec((din, th), lambda i, h: (0, h), single_buffer=weights_resident),  # W1
            spec((1, th), lambda i, h: (0, h), single_buffer=weights_resident),    # b1
            spec((th, dout), lambda i, h: (h, 0), single_buffer=weights_resident), # W2
            spec((1, dout), lambda i, h: (0, 0), single_buffer=True),              # b2
        ],
        out_specs=pl.BlockSpec((tm, dout), lambda i, h: (i, 0)),
        scratch_shapes=[pltpu.VMEM((tm, dout), jnp.float32)],
        compiler_params=pltpu.CompilerParams(
            dimension_semantics=("parallel", "arbitrary"),
            vmem_limit_bytes=vmem_limit,
        ),
    )(x2, w1, b1f, w2, b2f)
    return out.reshape(*orig_shape[:-1], dout)


if __name__ == "__main__":
    key = jax.random.PRNGKey(0)
    batch, seq = 2, 64
    in_features, hidden_features, out_features = 128, 256, 128  # lane-aligned

    k1, k2, k3, k4, k5 = jax.random.split(key, 5)
    x = jax.random.normal(k1, (batch, seq, in_features), jnp.float32)
    # Weights stored ONCE in (in, out) layout and bf16: no per-call transpose
    # or dtype-conversion passes over HBM (fixes the old `fc1_w.T` pattern).
    fc1_w = (jax.random.normal(k2, (in_features, hidden_features), jnp.float32)
             / math.sqrt(in_features)).astype(jnp.bfloat16)
    fc1_b = 0.02 * jax.random.normal(k3, (hidden_features,), jnp.float32)
    fc2_w = (jax.random.normal(k4, (hidden_features, out_features), jnp.float32)
             / math.sqrt(hidden_features)).astype(jnp.bfloat16)
    fc2_b = 0.02 * jax.random.normal(k5, (out_features,), jnp.float32)

    # Pure-JAX reference (exact GELU; dropout p=0 is identity), using the same
    # bf16 weight values upcast to f32.
    w1f = fc1_w.astype(jnp.float32)
    w2f = fc2_w.astype(jnp.float32)
    ref = jax.nn.gelu(x @ w1f + fc1_b, approximate=False) @ w2f + fc2_b

    tol = 0.12 if _epilogue_dtype(_device_kind()) == jnp.float32 else 0.25

    # 1) Weights fully resident (single hidden step, single-buffered weights).
    y = mlp_forward(x, fc1_w, fc1_b, fc2_w, fc2_b)
    y = jax.block_until_ready(y)
    assert y.shape == (batch, seq, out_features), y.shape
    assert bool(jnp.all(jnp.isfinite(y)))
    err1 = float(jnp.max(jnp.abs(y - ref)))
    assert err1 < tol, err1

    # 2) Force the H-tiled accumulation path (th=128 -> 2 "arbitrary" h-steps,
    #    f32 VMEM accumulator with pl.when init/finalize).
    y2 = mlp_forward(x, fc1_w, fc1_b, fc2_w, fc2_b, max_th=128)
    y2 = jax.block_until_ready(y2)
    assert bool(jnp.all(jnp.isfinite(y2)))
    err2 = float(jnp.max(jnp.abs(y2 - ref)))
    assert err2 < tol, err2

    print("KERNEL_OK")
</pallas_src>

<mosaic_0001>
module attributes {stable_mosaic.version = 11 : i64} {
  func.func @_k(%arg0: i32, %arg1: memref<8x128xf32, #tpu.memory_space<vmem>>, %arg2: memref<8x128xf32, #tpu.memory_space<vmem>>) attributes {dimension_semantics = [#tpu.dimension_semantics<arbitrary>], iteration_bounds = array<i64: 1>, scalar_prefetch = 0 : i64, scratch_operands = 0 : i64, tpu.core_type = #tpu.core_type<tc>, window_params = [{pipeline_mode = #tpu.pipeline_mode<synchronous>, transform_indices = @transform_0, window_bounds = array<i64: 8, 128>}, {pipeline_mode = #tpu.pipeline_mode<synchronous>, transform_indices = @transform_1, window_bounds = array<i64: 8, 128>}]} {
    %c0 = arith.constant 0 : index
    %c0_0 = arith.constant 0 : index
    %0 = vector.load %arg1[%c0, %c0_0] : memref<8x128xf32, #tpu.memory_space<vmem>>, vector<8x128xf32>
    %c0_1 = arith.constant 0 : index
    %c0_2 = arith.constant 0 : index
    %1 = vector.load %arg2[%c0_1, %c0_2] : memref<8x128xf32, #tpu.memory_space<vmem>>, vector<8x128xf32>
    tpu.vector_store %arg2[%c0_1, %c0_2], %0 {strides = array<i32>} : memref<8x128xf32, #tpu.memory_space<vmem>>, vector<8x128xf32>,
    return
  }
  func.func @transform_0(%arg0: i32) -> (i32, i32) {
    %c0_i32 = arith.constant 0 : i32
    %c0_i32_0 = arith.constant 0 : i32
    %c0_i32_1 = arith.constant 0 : i32
    return %c0_i32, %c0_i32_0 : i32, i32
  }
  func.func @transform_1(%arg0: i32) -> (i32, i32) {
    %c0_i32 = arith.constant 0 : i32
    %c0_i32_0 = arith.constant 0 : i32
    %c0_i32_1 = arith.constant 0 : i32
    return %c0_i32, %c0_i32_0 : i32, i32
  }
}

module attributes {stable_mosaic.version = 11 : i64} {
  func.func @_mlp_kernel(%arg0: i32, %arg1: i32, %arg2: memref<64x128xf32, #tpu.memory_space<vmem>>, %arg3: memref<128x256xbf16, #tpu.memory_space<vmem>>, %arg4: memref<1x256xf32, #tpu.memory_space<vmem>>, %arg5: memref<256x128xbf16, #tpu.memory_space<vmem>>, %arg6: memref<1x128xf32, #tpu.memory_space<vmem>>, %arg7: memref<64x128xf32, #tpu.memory_space<vmem>>, %arg8: memref<64x128xf32, #tpu.memory_space<vmem>>) attributes {dimension_semantics = [#tpu.dimension_semantics<parallel>, #tpu.dimension_semantics<arbitrary>], iteration_bounds = array<i64: 2, 1>, scalar_prefetch = 0 : i64, scratch_operands = 1 : i64, tpu.core_type = #tpu.core_type<tc>, window_params = [{transform_indices = @transform_0, window_bounds = array<i64: 64, 128>}, {transform_indices = @transform_1, window_bounds = array<i64: 128, 256>}, {transform_indices = @transform_2, window_bounds = array<i64: 1, 256>}, {transform_indices = @transform_3, window_bounds = array<i64: 256, 128>}, {pipeline_mode = #tpu.pipeline_mode<synchronous>, transform_indices = @transform_4, window_bounds = array<i64: 1, 128>}, {transform_indices = @transform_5, window_bounds = array<i64: 64, 128>}]} {
    %c0_i32 = arith.constant 0 : i32
    %0 = arith.cmpi eq, %arg1, %c0_i32 : i32
    %1 = arith.extui %0 : i1 to i32
    %c0_i32_0 = arith.constant 0 : i32
    %2 = arith.cmpi ne, %1, %c0_i32_0 : i32
    scf.if %2 {
      %cst_30 = arith.constant 0.000000e+00 : f32
      %59 = vector.broadcast %cst_30 : f32 to vector<64x128xf32>
      %c0_31 = arith.constant 0 : index
      %c0_32 = arith.constant 0 : index
      %60 = vector.load %arg8[%c0_31, %c0_32] : memref<64x128xf32, #tpu.memory_space<vmem>>, vector<64x128xf32>
      tpu.vector_store %arg8[%c0_31, %c0_32], %59 {strides = array<i32>} : memref<64x128xf32, #tpu.memory_space<vmem>>, vector<64x128xf32>,
    } else {
    }
    %c0 = arith.constant 0 : index
    %c0_1 = arith.constant 0 : index
    %3 = vector.load %arg2[%c0, %c0_1] : memref<64x128xf32, #tpu.memory_space<vmem>>, vector<64x128xf32>
    %4 = arith.truncf %3 : vector<64x128xf32> to vector<64x128xbf16>
    %c0_2 = arith.constant 0 : index
    %c0_3 = arith.constant 0 : index
    %5 = vector.load %arg3[%c0_2, %c0_3] : memref<128x256xbf16, #tpu.memory_space<vmem>>, vector<128x256xbf16>
    %cst = arith.constant dense<0.000000e+00> : vector<64x256xf32>
    %6 = tpu.matmul %4, %5, %cst {dimension_numbers = #tpu.dot_dimension_numbers<[1], [0], [0], [1], [0, 0, 1, 1], [], []>} : vector<64x128xbf16>, vector<128x256xbf16>, vector<64x256xf32> -> vector<64x256xf32>
    %c0_4 = arith.constant 0 : index
    %c0_5 = arith.constant 0 : index
    %7 = vector.load %arg4[%c0_4, %c0_5] : memref<1x256xf32, #tpu.memory_space<vmem>>, vector<1x256xf32>
    %8 = vector.broadcast %7 : vector<1x256xf32> to vector<64x256xf32>
    %9 = arith.addf %6, %8 : vector<64x256xf32>
    %cst_6 = arith.constant 5.000000e-01 : f32
    %10 = vector.broadcast %cst_6 : f32 to vector<64x256xf32>
    %11 = arith.mulf %10, %9 : vector<64x256xf32>
    %cst_7 = arith.constant 0.707106769 : f32
    %12 = vector.broadcast %cst_7 : f32 to vector<64x256xf32>
    %13 = arith.mulf %9, %12 : vector<64x256xf32>
    %cst_8 = arith.constant 0.000000e+00 : f32
    %14 = vector.broadcast %cst_8 : f32 to vector<64x256xf32>
    %15 = arith.cmpf oge, %13, %14 : vector<64x256xf32>
    %cst_9 = arith.constant 1.000000e+00 : f32
    %cst_10 = arith.constant -1.000000e+00 : f32
    %16 = vector.broadcast %cst_9 : f32 to vector<64x256xf32>
    %17 = vector.broadcast %cst_10 : f32 to vector<64x256xf32>
    %18 = arith.select %15, %16, %17 : vector<64x256xi1>, vector<64x256xf32>
    %19 = math.absf %13 : vector<64x256xf32>
    %cst_11 = arith.constant 0.327591091 : f32
    %20 = vector.broadcast %cst_11 : f32 to vector<64x256xf32>
    %21 = arith.mulf %20, %19 : vector<64x256xf32>
    %cst_12 = arith.constant 1.000000e+00 : f32
    %22 = vector.broadcast %cst_12 : f32 to vector<64x256xf32>
    %23 = arith.addf %22, %21 : vector<64x256xf32>
    %24 = tpu.reciprocal %23 {approx = true} : vector<64x256xf32> -> vector<64x256xf32>
    %cst_13 = arith.constant 1.06140542 : f32
    %25 = vector.broadcast %cst_13 : f32 to vector<64x256xf32>
    %26 = arith.mulf %25, %24 : vector<64x256xf32>
    %cst_14 = arith.constant -1.45315206 : f32
    %27 = vector.broadcast %cst_14 : f32 to vector<64x256xf32>
    %28 = arith.addf %26, %27 : vector<64x256xf32>
    %29 = arith.mulf %28, %24 : vector<64x256xf32>
    %cst_15 = arith.constant 1.42141378 : f32
    %30 = vector.broadcast %cst_15 : f32 to vector<64x256xf32>
    %31 = arith.addf %29, %30 : vector<64x256xf32>
    %32 = arith.mulf %31, %24 : vector<64x256xf32>
    %cst_16 = arith.constant -0.284496725 : f32
    %33 = vector.broadcast %cst_16 : f32 to vector<64x256xf32>
    %34 = arith.addf %32, %33 : vector<64x256xf32>
    %35 = arith.mulf %34, %24 : vector<64x256xf32>
    %cst_17 = arith.constant 0.254829586 : f32
    %36 = vector.broadcast %cst_17 : f32 to vector<64x256xf32>
    %37 = arith.addf %35, %36 : vector<64x256xf32>
    %38 = arith.mulf %37, %24 : vector<64x256xf32>
    %cst_18 = arith.constant 0.000000e+00 : f32
    %39 = vector.broadcast %cst_18 : f32 to vector<64x256xf32>
    %40 = arith.subf %39, %19 : vector<64x256xf32>
    %41 = arith.mulf %40, %19 : vector<64x256xf32>
    %42 = math.exp %41 : vector<64x256xf32>
    %43 = arith.mulf %38, %42 : vector<64x256xf32>
    %cst_19 = arith.constant 1.000000e+00 : f32
    %44 = vector.broadcast %cst_19 : f32 to vector<64x256xf32>
    %45 = arith.subf %44, %43 : vector<64x256xf32>
    %46 = arith.mulf %18, %45 : vector<64x256xf32>
    %cst_20 = arith.constant 1.000000e+00 : f32
    %47 = vector.broadcast %cst_20 : f32 to vector<64x256xf32>
    %48 = arith.addf %47, %46 : vector<64x256xf32>
    %49 = arith.mulf %11, %48 : vector<64x256xf32>
    %c0_21 = arith.constant 0 : index
    %c0_22 = arith.constant 0 : index
    %50 = vector.load %arg8[%c0_21, %c0_22] : memref<64x128xf32, #tpu.memory_space<vmem>>, vector<64x128xf32>
    %51 = arith.truncf %49 : vector<64x256xf32> to vector<64x256xbf16>
    %c0_23 = arith.constant 0 : index
    %c0_24 = arith.constant 0 : index
    %52 = vector.load %arg5[%c0_23, %c0_24] : memref<256x128xbf16, #tpu.memory_space<vmem>>, vector<256x128xbf16>
    %cst_25 = arith.constant dense<0.000000e+00> : vector<64x128xf32>
    %53 = tpu.matmul %51, %52, %cst_25 {dimension_numbers = #tpu.dot_dimension_numbers<[1], [0], [0], [1], [0, 0, 1, 1], [], []>} : vector<64x256xbf16>, vector<256x128xbf16>, vector<64x128xf32> -> vector<64x128xf32>
    %54 = arith.addf %50, %53 : vector<64x128xf32>
    %c0_26 = arith.constant 0 : index
    %c0_27 = arith.constant 0 : index
    %55 = vector.load %arg8[%c0_26, %c0_27] : memref<64x128xf32, #tpu.memory_space<vmem>>, vector<64x128xf32>
    tpu.vector_store %arg8[%c0_26, %c0_27], %54 {strides = array<i32>} : memref<64x128xf32, #tpu.memory_space<vmem>>, vector<64x128xf32>,
    %c0_i32_28 = arith.constant 0 : i32
    %56 = arith.cmpi eq, %arg1, %c0_i32_28 : i32
    %57 = arith.extui %56 : i1 to i32
    %c0_i32_29 = arith.constant 0 : i32
    %58 = arith.cmpi ne, %57, %c0_i32_29 : i32
    scf.if %58 {
      %c0_30 = arith.constant 0 : index
      %c0_31 = arith.constant 0 : index
      %59 = vector.load %arg8[%c0_30, %c0_31] : memref<64x128xf32, #tpu.memory_space<vmem>>, vector<64x128xf32>
      %c0_32 = arith.constant 0 : index
      %c0_33 = arith.constant 0 : index
      %60 = vector.load %arg6[%c0_32, %c0_33] : memref<1x128xf32, #tpu.memory_space<vmem>>, vector<1x128xf32>
      %61 = vector.broadcast %60 : vector<1x128xf32> to vector<64x128xf32>
      %62 = arith.addf %59, %61 : vector<64x128xf32>
      %c0_34 = arith.constant 0 : index
      %c0_35 = arith.constant 0 : index
      %63 = vector.load %arg7[%c0_34, %c0_35] : memref<64x128xf32, #tpu.memory_space<vmem>>, vector<64x128xf32>
      tpu.vector_store %arg7[%c0_34, %c0_35], %62 {strides = array<i32>} : memref<64x128xf32, #tpu.memory_space<vmem>>, vector<64x128xf32>,
    } else {
    }
    return
  }
  func.func @transform_0(%arg0: i32, %arg1: i32) -> (i32, i32) {
    %c0_i32 = arith.constant 0 : i32
    %c0_i32_0 = arith.constant 0 : i32
    return %arg0, %c0_i32 : i32, i32
  }
  func.func @transform_1(%arg0: i32, %arg1: i32) -> (i32, i32) {
    %c0_i32 = arith.constant 0 : i32
    %c0_i32_0 = arith.constant 0 : i32
    return %c0_i32, %arg1 : i32, i32
  }
  func.func @transform_2(%arg0: i32, %arg1: i32) -> (i32, i32) {
    %c0_i32 = arith.constant 0 : i32
    %c0_i32_0 = arith.constant 0 : i32
    return %c0_i32, %arg1 : i32, i32
  }
  func.func @transform_3(%arg0: i32, %arg1: i32) -> (i32, i32) {
    %c0_i32 = arith.constant 0 : i32
    %c0_i32_0 = arith.constant 0 : i32
    return %arg1, %c0_i32 : i32, i32
  }
  func.func @transform_4(%arg0: i32, %arg1: i32) -> (i32, i32) {
    %c0_i32 = arith.constant 0 : i32
    %c0_i32_0 = arith.constant 0 : i32
    %c0_i32_1 = arith.constant 0 : i32
    return %c0_i32, %c0_i32_0 : i32, i32
  }
  func.func @transform_5(%arg0: i32, %arg1: i32) -> (i32, i32) {
    %c0_i32 = arith.constant 0 : i32
    %c0_i32_0 = arith.constant 0 : i32
    return %arg0, %c0_i32 : i32, i32
  }
}

</mosaic_0001>

<bundles_post_ra>
// kernel: tpu_custom_call.1
= control target key start
LH: loop header
LB: loop body
LE: loop exit
PB: predicated region body
PF: predicated region fallthrough
CT: control target
= control target key end

     0   :  { %6 = vsyncpa [#allocation3], 0  ;;  %s114_s0 = inlined_call_operand.hbm [shape: f32[8,128], index: 0, kind: input, shape index: {}]   ;;  %s115_s1 = inlined_call_operand.hbm [shape: f32[8,128], index: 1, kind: output, shape index: {}]  }
   0x1   :  { %7 = vsyncpa [#allocation4], 0  ;;  %s13_s8 = sshll.u32 %s114_s0, 4  ;;  %s96_s9 = smov [#allocation2]   ;;  %s14_s8 = int_to_ptr.hbm [resolvable:$true] %s13_s8 }
   0x2   :  { %s15_s10 = sshll.u32 %s96_s9, 4  ;;  %s16_s10 = int_to_ptr.vmem [resolvable:$true] %s15_s10 }
   0x3   :  { %18 = dma.hbm_to_vmem [thread:$0]  %s14_s8, 128, %s16_s10, [#allocation3]  }
   0x4   :  { %92 = dma.done.wait [#allocation3], 128  }
   0x5   :  { %93 = vsyncadd [#allocation3], 4294967168  ;;  %s97_s11 = smov [#allocation5]   ;;  %s32_s15 = sshll.u32 %s115_s1, 4  ;;  %v23_v0 = vld [vmem:[#allocation2] sm:$0xff]  ;;  %s33_s15 = int_to_ptr.hbm [resolvable:$true] %s32_s15 }
   0x6   :  { %s30_s12 = sshll.u32 %s97_s11, 4  ;;  %24 = vst [vmem:[#allocation5] sm:$0xff] %v23_v0  ;;  %s31_s12 = int_to_ptr.vmem [resolvable:$true] %s30_s12 }
   0x7   :  { %35 = dma.vmem_to_hbm [thread:$0]  %s31_s12, 128, %s33_s15, [#allocation4]  }
   0x8   :  { %94 = dma.done.wait [#allocation4], 128  }
   0x9   :  { %95 = vsyncadd [#allocation4], 4294967168 }
   0xa   :  { %40 = vsyncpa [#allocation3], 1 }
   0xb   :  { %41 = vsyncpa [#allocation4], 1 }

// kernel: tpu_custom_call.1
= control target key start
LH: loop header
LB: loop body
LE: loop exit
PB: predicated region body
PF: predicated region fallthrough
CT: control target
= control target key end

     0   :  { %s2490_s0 = inlined_call_operand.hbm [shape: f32[128,128], index: 0, kind: input, shape index: {}]   ;;  %s2491_s1 = inlined_call_operand.hbm [shape: bf16[128,256], index: 1, kind: input, shape index: {}]   ;;  %s2492_s2 = inlined_call_operand.hbm [shape: f32[1,256], index: 2, kind: input, shape index: {}]   ;;  %s2493_s3 = inlined_call_operand.hbm [shape: bf16[256,128], index: 3, kind: input, shape index: {}]   ;;  %s2494_s4 = inlined_call_operand.vmem [shape: f32[1,128], index: 4, kind: input, shape index: {}]   ;;  %s2495_s5 = inlined_call_operand.hbm [shape: f32[128,128], index: 5, kind: output, shape index: {}]  }
   0x1   :  { %2511 = sst [smem:[#allocation28_spill]] %s2491_s1 }
   0x2   :  { %2512 = sst [smem:[#allocation29_spill]] %s2492_s2 }
   0x3   :  { %2513 = sst [smem:[#allocation30_spill]] %s2493_s3 }
   0x4   :  { %10 = vsyncpa [#allocation4], 0 }
   0x5   :  { %12 = vsyncpa [#allocation4 + $0x1], 0 }
   0x6   :  { %13 = vsyncpa [#allocation7], 0 }
   0x7   :  { %14 = vsyncpa [#allocation10], 0 }
   0x8   :  { %15 = vsyncpa [#allocation5], 0 }
   0x9   :  { %17 = vsyncpa [#allocation5 + $0x1], 0  ;;  %s1914_s18 = smov 0   ;;  %s1916_s19 = smov 0  }
   0xa   :  { %s1918_s20 = smov 0   ;;  %s1920_s21 = smov 0  }
   0xb   :  { %s1922_s22 = smov 0   ;;  %s1924_s23 = smov 0  }
   0xc LB: > { %s1314_s24 = sadd.s32 4294967295, %s1872_s23   ;;  %s1315_s25 = sadd.s32 4294967294, %s1872_s23   ;;  %s1872_s23 = sphi %s1924_s23, %s23_s23   ;;  %s1868_s22 = sphi %s1922_s22, %s2558_s22   ;;  %s1864_s21 = sphi %s1920_s21, %s2557_s21   ;;  %s1860_s20 = sphi %s1918_s20, %s2556_s20   ;;  %s1856_s19 = sphi %s1916_s19, %s2555_s19   ;;  %s1852_s18 = sphi %s1914_s18, %s2554_s18  }
   0xd   : > { %p55_p0 = scmp.ne.s32.totalorder %s1856_s19, %s1852_s18  ;;  %p1948_p1 = scmp.eq.s32.totalorder %s1314_s24, 0 }
   0xe   : > { %p1952_p2 = scmp.eq.s32.totalorder %s1314_s24, 1  ;;  %p184_p3 = scmp.eq.s32.totalorder %s1315_s25, 1 }
   0xf   : > { %p1958_p4 = por %p1948_p1, %p55_p0  ;;  %p1316_p5 = scmp.ge.s32.totalorder %s1872_s23, 1 }
  0x10   : > { %p1963_p6 = por %p184_p3, %p55_p0  ;;  %p191_p7 = scmp.lt.s32.totalorder %s1872_s23, 3 }
  0x11   : > { %s2518_s1 = sld [smem:[#allocation28_spill]]  ;;  %s1874_s9 = smov [#allocation6]  }
  0x12   : > { %p1971_p8 = pnand %p1316_p5, %p191_p7  ;;  %s207_s10 = sshll.u32 %s1874_s9, 4  ;;  %s208_s10 = int_to_ptr.vmem [resolvable:$true] %s207_s10 }
  0x13   : > { %p1320_p11 = scmp.ge.s32.totalorder %s1872_s23, 2  ;;  %s2521_s2 = sld [smem:[#allocation29_spill]] }
  0x14   : > { %p1513_p9 = pneg %p1971_p8  ;;  %s2496_s15 = smov 128  }
  0x15   : > { %s2497_s16 = smov 8   ;;  %s1877_s17 = smov [#allocation8]  }
  0x16   : > { %p1979_p10 = pnand %p1513_p9, %p1948_p1  ;;  %s224_s24 = sshll.u32 %s1877_s17, 4  ;;  %s225_s24 = int_to_ptr.vmem [resolvable:$true] %s224_s24 }
  0x17   : > { %s205_s7 = sshll.u32 %s2518_s1, 4  ;;  %s2522_s3 = sld [smem:[#allocation30_spill]]  ;;  %s206_s7 = int_to_ptr.hbm [resolvable:$true] %s205_s7 }
  0x18   : > { %1516 = dma.hbm_to_vmem [thread:$0]  (!%p1979_p10), %s206_s7, 2048, %s208_s10, [#allocation7], %s2496_s15, %s2496_s15, %s2497_s16  }
  0x19   : > { %s222_s14 = sshll.u32 %s2521_s2, 4  ;;  %s1878_s9 = smov [#allocation9]   ;;  %s223_s14 = int_to_ptr.hbm [resolvable:$true] %s222_s14 }
  0x1a   : > { %1519 = dma.hbm_to_vmem [thread:$0]  (!%p1979_p10), %s223_s14, 32, %s225_s24, [#allocation7]  }
  0x1b   : > { %s238_s12 = sshll.u32 %s1878_s9, 4  ;;  %s1879_s13 = smov 64   ;;  %s239_s12 = int_to_ptr.vmem [resolvable:$true] %s238_s12 }
  0x1c   : > { %s1880_s7 = smov 4   ;;  %s42_s10 = sadd.s32 1, %s1860_s20 }
  0x1d   : > { %s236_s6 = sshll.u32 %s2522_s3, 4  ;;  %s35_s17 = sadd.s32 1, %s1868_s22  ;;  %s237_s6 = int_to_ptr.hbm [resolvable:$true] %s236_s6 }
  0x1e   : > { %1522 = dma.hbm_to_vmem [thread:$0]  (!%p1979_p10), %s237_s6, 2048, %s239_s12, [#allocation10], %s1879_s13, %s1879_s13, %s1880_s7  }
  0x1f   : > { %p49_p12 = scmp.ne.s32.totalorder %s1860_s20, %s1856_s19  ;;  %p37_p13 = scmp.ge.s32.totalorder %s35_s17, 2 }
  0x20   : > { %p50_p0 = scmp.eq.s32.totalorder %s1872_s23, 0  ;;  %p1534_p5 = scmp.lt.s32.totalorder %s1872_s23, 2 }
  0x21   : > { %p2006_p3 = por %p1952_p2, %p49_p12  ;;  %s2560_s17 = smov (%p37_p13, %s35_s17), 0 }
  0x22   : > { %p2013_p7 = por %p50_p0, %p49_p12  ;;  %s255_s11 = sand.u32 1, %s1860_s20  }
  0x23   : > { %s39_s24 = ssub.s32 %s1868_s22, %s2560_s17  ;;  %s1321_s30 = sshll.u32 %s255_s11, 6 }
  0x24   : > { %p40_p9 = scmp.eq.s32.totalorder %s39_s24, 0  ;;  %s1463_s6 = sshll.u32 %s1868_s22, 6 }
  0x25   : > { %s264_s13 = scalar_lea.hbm %s2490_s0, %s1463_s6  ;;  %s259_s7 = scalar_lea.vmem [#allocation3], %s1321_s30 }
  0x26   : > { %s2022_s27 = scalar_select %p40_p9, %s1860_s20, %s42_s10  }
  0x27   : > { %s267_s15 = sshll.u32 %s259_s7, 4  ;;  %s265_s16 = sshll.u32 %s264_s13, 4  ;;  %s268_s15 = int_to_ptr.vmem [resolvable:$true] %s267_s15  ;;  %s266_s16 = int_to_ptr.hbm [resolvable:$true] %s265_s16 }
  0x28   : > { %p1524_p2 = pnand %p1534_p5, %p2013_p7  ;;  %s256_s1 = scalar_lea.sflag [#allocation4], %s255_s11 }
  0x29   : > { %s2525_s2 = smov 8   ;;  %s2526_s3 = smov 128  }
  0x2a   : > { %1526 = dma.hbm_to_vmem [thread:$0]  (!%p1524_p2), %s266_s16, 1024, %s268_s15, %s256_s1, %s2526_s3, %s2526_s3, %s2525_s2  }
  0x2b   : > { %279 = sbr.rel (%p1971_p8) target bundleno = 496 (0x1f0), region = 40 }
  0x30   : > { %s2037_s10 = sand.u32 1, %s1856_s19  }
  0x31   : > { %s1325_s24 = sshll.u32 %s2037_s10, 6  ;;  %s282_s30 = scalar_lea.sflag [#allocation4], %s2037_s10 }
  0x32   : > { %s2043_s14 = scalar_lea.vmem [#allocation3], %s1325_s24 }
  0x33   : > { %1835 = dma.done.wait (%p1958_p4), %s282_s30, 1024  }
  0x34   : > { %1837 = vsyncadd (%p1958_p4), %s282_s30, 4294966272 }
  0x35   : > { %1839 = dma.done.wait (%p1948_p1), [#allocation7], 2080  }
  0x36   : > { %1841 = vsyncadd (%p1948_p1), [#allocation7], 4294965216 }
  0x37   : > { %1843 = dma.done.wait (%p1948_p1), [#allocation10], 2048  }
  0x38   : > { %1845 = vsyncadd (%p1948_p1), [#allocation10], 4294965248  ;;  %v1388_v0 = vld [vmem:[#allocation6 + $0x70] sm:$0xf]  ;;  %v1479_v1 = vld [vmem:[#allocation6 + $0x74] sm:$0xf0] }
  0x39   : > { %v1478_v2 = vld [vmem:[#allocation6 + $0x74] sm:$0xf]  ;;  %v1389_v3 = vor.u32 %v1479_v1, %v1388_v0  ;;  %v1390_v4 = vld [vmem:[#allocation6 + $0x78] sm:$0xf0]  ;;  %v1380_v5 = vld [vmem:[#allocation6 + $0x60] sm:$0xf] }
  0x3a   : > { %v1477_v6 = vld [vmem:[#allocation6 + $0x64] sm:$0xf0]  ;;  %v1393_v7 = vor.u32 %v1478_v2, %v1390_v4  ;;  %v1476_v8 = vld [vmem:[#allocation6 + $0x64] sm:$0xf]  ;;  %v1382_v9 = vld [vmem:[#allocation6 + $0x68] sm:$0xf0] }
  0x3b   : > { %459 = vmatpush.bf16.msra.mxu0 %v1389_v3  ;;  %v1381_v10 = vor.u32 %v1477_v6, %v1380_v5  ;;  %v1385_v11 = vor.u32 %v1476_v8, %v1382_v9  ;;  %v1372_v12 = vld [vmem:[#allocation6 + $0x50] sm:$0xf]  ;;  %v1475_v13 = vld [vmem:[#allocation6 + $0x54] sm:$0xf0]  ;;  %v1474_v14 = vld [vmem:[#allocation6 + $0x54] sm:$0xf] }
  0x3c   : > { %488 = vmatpush.bf16.msra.mxu1 %v1393_v7  ;;  %v1374_v15 = vld [vmem:[#allocation6 + $0x58] sm:$0xf0]  ;;  %v1373_v16 = vor.u32 %v1475_v13, %v1372_v12  ;;  %v1364_v18 = vld [vmem:[#allocation6 + $0x40] sm:$0xf]  ;;  %v1473_v19 = vld [vmem:[#allocation6 + $0x44] sm:$0xf0] }
  0x3d   : > { %v1377_v17 = vor.u32 %v1474_v14, %v1374_v15  ;;  %v1472_v20 = vld [vmem:[#allocation6 + $0x44] sm:$0xf]  ;;  %v1366_v21 = vld [vmem:[#allocation6 + $0x48] sm:$0xf0]  ;;  %v1365_v22 = vor.u32 %v1473_v19, %v1364_v18  ;;  %v1356_v24 = vld [vmem:[#allocation6 + $0x30] sm:$0xf] }
  0x3e   : > { %v1369_v23 = vor.u32 %v1472_v20, %v1366_v21  ;;  %v1471_v25 = vld [vmem:[#allocation6 + $0x34] sm:$0xf0]  ;;  %v1470_v26 = vld [vmem:[#allocation6 + $0x34] sm:$0xf]  ;;  %v1358_v27 = vld [vmem:[#allocation6 + $0x38] sm:$0xf0] }
  0x3f   : > { %460 = vmatpush.bf16.msra.mxu0 %v1381_v10  ;;  %v1357_v28 = vor.u32 %v1471_v25, %v1356_v24  ;;  %v1361_v29 = vor.u32 %v1470_v26, %v1358_v27  ;;  %v1348_v30 = vld [vmem:[#allocation6 + $0x20] sm:$0xf]  ;;  %v1469_v31 = vld [vmem:[#allocation6 + $0x24] sm:$0xf0]  ;;  %v1468_v32 = vld [vmem:[#allocation6 + $0x24] sm:$0xf] }
  0x40   : > { %489 = vmatpush.bf16.msra.mxu1 %v1385_v11  ;;  %v1350_v33 = vld [vmem:[#allocation6 + $0x28] sm:$0xf0]  ;;  %v1349_v34 = vor.u32 %v1469_v31, %v1348_v30  ;;  %v1340_v36 = vld [vmem:[#allocation6 + $0x10] sm:$0xf]  ;;  %v1467_v37 = vld [vmem:[#allocation6 + $0x14] sm:$0xf0] }
  0x41   : > { %v1353_v35 = vor.u32 %v1468_v32, %v1350_v33  ;;  %v1466_v38 = vld [vmem:[#allocation6 + $0x14] sm:$0xf]  ;;  %v1342_v39 = vld [vmem:[#allocation6 + $0x18] sm:$0xf0]  ;;  %v1341_v40 = vor.u32 %v1467_v37, %v1340_v36  ;;  %v1332_v42 = vld [vmem:[#allocation6] sm:$0xf] }
  0x42   : > { %v1345_v41 = vor.u32 %v1466_v38, %v1342_v39  ;;  %v1465_v43 = vld [vmem:[#allocation6 + $0x4] sm:$0xf0]  ;;  %v1464_v44 = vld [vmem:[#allocation6 + $0x4] sm:$0xf]  ;;  %v1334_v45 = vld [vmem:[#allocation6 + $0x8] sm:$0xf0] }
  0x43   : > { %461 = vmatpush.bf16.msra.mxu0 %v1373_v16  ;;  %v1333_v46 = vor.u32 %v1465_v43, %v1332_v42  ;;  %v345_v47 = vld [vmem:[%s2043_s14] sm:$0xff]  ;;  %v346_v48 = vld [vmem:[%s2043_s14 + $0x8] sm:$0xff]  ;;  %v1337_v49 = vor.u32 %v1464_v44, %v1334_v45  ;;  %v347_v51 = vld [vmem:[%s2043_s14 + $0x10] sm:$0xff]  ;;  %s2441_s3 = scalar_lea.vmem [#allocation11], %s1325_s24  ;;  %s1496_s26 = sshll.u32 %s1864_s21, 6 }
  0x44   : > { %490 = vmatpush.bf16.msra.mxu1 %v1377_v17  ;;  %v353_v50 = vpack.c.bf16 %v346_v48, %v345_v47  ;;  %v348_v52 = vld [vmem:[%s2043_s14 + $0x18] sm:$0xff]  ;;  %v349_v54 = vld [vmem:[%s2043_s14 + $0x20] sm:$0xff]  ;;  %v350_v55 = vld [vmem:[%s2043_s14 + $0x28] sm:$0xff]  ;;  %s1194_s15 = scalar_lea.hbm %s2495_s5, %s1496_s26  ;;  %s1195_s16 = sshll.u32 %s2441_s3, 4  ;;  %s1196_s16 = int_to_ptr.vmem [resolvable:$true] %s1195_s16 }
  0x45   : > { %v354_v53 = vpack.c.bf16 %v348_v52, %v347_v51  ;;  %v355_v56 = vpack.c.bf16 %v350_v55, %v349_v54  ;;  %v351_v57 = vld [vmem:[%s2043_s14 + $0x30] sm:$0xff]  ;;  %v352_v58 = vld [vmem:[%s2043_s14 + $0x38] sm:$0xff]  ;;  %v373_v62 = vld [vmem:[#allocation8] sm:$0x3]  ;;  %v2499_v52 = vmov -1.0   ;;  %s1197_s11 = sshll.u32 %s1194_s15, 4  ;;  %s1198_s11 = int_to_ptr.hbm [resolvable:$true] %s1197_s11 }
  0x46   : > { %v356_v59 = vpack.c.bf16 %v352_v58, %v351_v57  ;;  %v1487_v60 = vld [vmem:[#allocation9 + $0x38] sm:$0xff]  ;;  %v1486_v63 = vld [vmem:[#allocation9 + $0x30] sm:$0xff]  ;;  %v2065_v1 = vperm.slane %v373_v62, 0  ;;  %v2067_v3 = vperm.slane %v373_v62, 1  ;;  %v1485_v4 = vld [vmem:[#allocation9 + $0x28] sm:$0xff]  ;;  %s1183_s6 = scalar_lea.sflag [#allocation5], %s2037_s10 }
  0x47   : > { %462 = vmatpush.bf16.msra.mxu0 %v1365_v22  ;;  %v1495_v61 = vld [vmem:[#allocation9 + $0x78] sm:$0xff]  ;;  %1077 = vmatpush.bf16.msra.mxu2 %v1487_v60  ;;  %v1494_v0 = vld [vmem:[#allocation9 + $0x70] sm:$0xff]  ;;  %v1493_v5 = vld [vmem:[#allocation9 + $0x68] sm:$0xff]  ;;  %s1796_s9 = sshra.s32 %s1198_s11, 4  ;;  %s1802_s7 = scalar_lea.hbm %s2495_s5, 128  ;;  %s1797_s9 = int_to_ptr.hbm [resolvable:$true] %s1796_s9 }
  0x48   : > { %491 = vmatpush.bf16.msra.mxu1 %v1369_v23  ;;  %1106 = vmatpush.bf16.msra.mxu3 %v1495_v61  ;;  %v1484_v10 = vld [vmem:[#allocation9 + $0x20] sm:$0xff]  ;;  %v1483_v16 = vld [vmem:[#allocation9 + $0x18] sm:$0xff]  ;;  %v1482_v24 = vld [vmem:[#allocation9 + $0x10] sm:$0xff]  ;;  %s1798_s21 = scalar_lea.hbm %s1797_s9, 64  ;;  %p1803_p10 = scmp.lt.s32.totalorder %s1797_s9, %s2495_s5 }
  0x49   : > { %v1492_v11 = vld [vmem:[#allocation9 + $0x60] sm:$0xff]  ;;  %v1491_v17 = vld [vmem:[#allocation9 + $0x58] sm:$0xff]  ;;  %v1490_v26 = vld [vmem:[#allocation9 + $0x50] sm:$0xff]  ;;  %p1799_p1 = scmp.ne.s32.totalorder %s1797_s9, %s1798_s21  ;;  %p1804_p12 = scmp.lt.s32.totalorder %s1802_s7, %s1798_s21 }
  0x4a   : > { %v1481_v32 = vld [vmem:[#allocation9 + $0x8] sm:$0xff] }
  0x4b   : > { %463 = vmatpush.bf16.msra.mxu0 %v1357_v28  ;;  %1078 = vmatpush.bf16.msra.mxu2 %v1486_v63  ;;  %v1489_v33 = vld [vmem:[#allocation9 + $0x48] sm:$0xff]  ;;  %p1800_p4 = pnand %p1799_p1, %p2006_p3  ;;  %p1805_p13 = por %p1804_p12, %p1803_p10 }
  0x4c   : > { %492 = vmatpush.bf16.msra.mxu1 %v1361_v29  ;;  %1107 = vmatpush.bf16.msra.mxu3 %v1494_v0 }
  0x4d   : > { %p1801_p8 = pneg %p1800_p4 }
  0x4f   : > { %464 = vmatpush.bf16.msra.mxu0 %v1349_v34  ;;  %1079 = vmatpush.bf16.msra.mxu2 %v1485_v4  ;;  %p1806_p0 = pnand %p1805_p13, %p1801_p8 }
  0x50   : > { %493 = vmatpush.bf16.msra.mxu1 %v1353_v35  ;;  %1108 = vmatpush.bf16.msra.mxu3 %v1493_v5 }
  0x53   : > { %465 = vmatpush.bf16.msra.mxu0 %v1341_v40  ;;  %1080 = vmatpush.bf16.msra.mxu2 %v1484_v10 }
  0x54   : > { %494 = vmatpush.bf16.msra.mxu1 %v1345_v41  ;;  %1109 = vmatpush.bf16.msra.mxu3 %v1492_v11 }
  0x57   : > { %466 = vmatpush.bf16.msra.mxu0 %v1333_v46  ;;  %1081 = vmatpush.bf16.msra.mxu2 %v1483_v16  ;;  %v1480_v46 = vld [vmem:[#allocation9] sm:$0xff] }
  0x58   : > { %495 = vmatpush.bf16.msra.mxu1 %v1337_v49  ;;  %1110 = vmatpush.bf16.msra.mxu3 %v1491_v17 }
  0x5a   : > { %467 = vmatmul.bf16.vlgmr.msra.gmra.mxu0 %v353_v50 }
  0x5b   : > { %496 = vmatmul.bf16.vlgmr.msra.gmra.mxu1 %v353_v50  ;;  %1082 = vmatpush.bf16.msra.mxu2 %v1482_v24  ;;  %v1488_v50 = vld [vmem:[#allocation9 + $0x40] sm:$0xff] }
  0x5c   : > { %1111 = vmatpush.bf16.msra.mxu3 %v1490_v26 }
  0x5f   : > { %1083 = vmatpush.bf16.msra.mxu2 %v1481_v32 }
  0x60   : > { %1112 = vmatpush.bf16.msra.mxu3 %v1489_v33 }
  0x63   : > { %1084 = vmatpush.bf16.msra.mxu2 %v1480_v46 }
  0x64   : > { %1113 = vmatpush.bf16.msra.mxu3 %v1488_v50 }
  0x6a   : > { %472 = vmatmul.bf16.gmra.mxu0 %v354_v53 }
  0x6b   : > { %501 = vmatmul.bf16.gmra.mxu1 %v354_v53 }
  0x7a   : > { %477 = vmatmul.bf16.gmra.mxu0 %v355_v56 }
  0x7b   : > { %506 = vmatmul.bf16.gmra.mxu1 %v355_v56 }
  0x8a   : > { %482 = vmatmul.bf16.gmra.mxu0 %v356_v59 }
  0x8b   : > { %511 = vmatmul.bf16.gmra.mxu1 %v356_v59 }
  0xd7   : > { %v468_v2 = vpop.f32.mrf.mxu0 }
  0xd8   : > { %v469_v6 = vadd.f32 %v468_v2, %v2065_v1  ;;  %v497_v7 = vpop.f32.mrf.mxu1 }
  0xd9   : > { %v498_v9 = vadd.f32 %v497_v7, %v2067_v3 }
  0xda   : > { %v533_v8 = vmul.f32 0.70710677, %v469_v6  ;;  %v2088_v47 = vmul.f32 0.5, %v469_v6 }
  0xdb   : > { %v534_v14 = vmul.f32 0.70710677, %v498_v9  ;;  %v2090_v48 = vmul.f32 0.5, %v498_v9 }
  0xdc   : > { %v581_v12 = vand.u32 2147483647, %v533_v8  ;;  %vm549_vm0 = vcmp.ge.f32.partialorder %v533_v8, 0.0 }
  0xdd   : > { %v582_v23 = vand.u32 2147483647, %v534_v14  ;;  %vm550_vm1 = vcmp.ge.f32.partialorder %v534_v14, 0.0  ;;  %v2093_v53 = vsel %vm549_vm0, 1.0, %v2499_v52 }
  0xde   : > { %v597_v13 = vmul.f32 0.3275911, %v581_v12  ;;  %v789_v28 = vsub.f32 0.0, %v581_v12  ;;  %v2100_v58 = vsel %vm550_vm1, 1.0, %v2499_v52 }
  0xdf   : > { %v470_v15 = vpop.f32.mrf.mxu0  ;;  %v790_v30 = vsub.f32 0.0, %v582_v23  ;;  %v598_v35 = vmul.f32 0.3275911, %v582_v23 }
  0xe0   : > { %v613_v18 = vadd.f32 1.0, %v597_v13  ;;  %v471_v19 = vadd.f32 %v470_v15, %v2065_v1  ;;  %v499_v20 = vpop.f32.mrf.mxu1  ;;  %v805_v42 = vmul.f32 %v789_v28, %v581_v12 }
  0xe1   : > { %v500_v21 = vadd.f32 %v499_v20, %v2067_v3  ;;  %v806_v44 = vmul.f32 %v790_v30, %v582_v23  ;;  %v614_v49 = vadd.f32 1.0, %v598_v35 }
  0xe2   : > { %1598 = vrcp.f32 %v613_v18  ;;  %v2073_v22 = vmul.f32 0.70710677, %v471_v19  ;;  %v821_v57 = vmul.f32 1.442695, %v805_v42  ;;  %v2102_v59 = vmul.f32 0.5, %v471_v19 }
  0xe3   : > { %v2076_v27 = vmul.f32 0.70710677, %v500_v21  ;;  %v823_v61 = vmul.f32 1.442695, %v806_v44  ;;  %v2109_v4 = vmul.f32 0.5, %v500_v21 }
  0xe4   : > { %v583_v25 = vand.u32 2147483647, %v2073_v22  ;;  %vm551_vm2 = vcmp.ge.f32.partialorder %v2073_v22, 0.0 }
  0xe5   : > { %v584_v39 = vand.u32 2147483647, %v2076_v27  ;;  %vm552_vm3 = vcmp.ge.f32.partialorder %v2076_v27, 0.0  ;;  %v2116_v11 = vsel %vm551_vm2, 1.0, %v2499_v52 }
  0xe6   : > { %v599_v29 = vmul.f32 0.3275911, %v583_v25  ;;  %v791_v45 = vsub.f32 0.0, %v583_v25  ;;  %v2122_v17 = vsel %vm552_vm3, 1.0, %v2499_v52 }
  0xe7   : > { %v473_v31 = vpop.f32.mrf.mxu0  ;;  %v600_v54 = vmul.f32 0.3275911, %v584_v39  ;;  %v792_v55 = vsub.f32 0.0, %v584_v39 }
  0xe8   : > { %v2078_v34 = vpop.eup %1598  ;;  %v615_v36 = vadd.f32 1.0, %v599_v29  ;;  %v474_v37 = vadd.f32 %v473_v31, %v2065_v1  ;;  %v502_v38 = vpop.f32.mrf.mxu1  ;;  %v807_v62 = vmul.f32 %v791_v45, %v583_v25 }
  0xe9   : > { %v2083_v40 = vadd.f32 %v502_v38, %v2067_v3  ;;  %v645_v41 = vmul.f32 1.0614054, %v2078_v34  ;;  %v616_v7 = vadd.f32 1.0, %v600_v54  ;;  %v808_v8 = vmul.f32 %v792_v55, %v584_v39 }
  0xea   : > { %1600 = vrcp.f32 %v615_v36  ;;  %v2086_v43 = vmul.f32 0.70710677, %v474_v37  ;;  %v825_v14 = vmul.f32 1.442695, %v807_v62  ;;  %v2124_v18 = vmul.f32 0.5, %v474_v37 }
  0xeb   : > { %v661_v51 = vadd.f32 -1.4531521, %v645_v41  ;;  %v2096_v56 = vmul.f32 0.70710677, %v2083_v40  ;;  %1602 = vrcp.f32 %v614_v49  ;;  %v827_v21 = vmul.f32 1.442695, %v808_v8 }
  0xec   : > { %v585_v60 = vand.u32 2147483647, %v2086_v43  ;;  %1604 = vpow2.f32 %v821_v57  ;;  %vm553_vm4 = vcmp.ge.f32.partialorder %v2086_v43, 0.0  ;;  %v2133_v28 = vmul.f32 0.5, %v2083_v40 }
  0xed   : > { %v677_v0 = vmul.f32 %v2078_v34, %v661_v51  ;;  %v586_v9 = vand.u32 2147483647, %v2096_v56  ;;  %1606 = vpow2.f32 %v823_v61  ;;  %vm554_vm5 = vcmp.ge.f32.partialorder %v2096_v56, 0.0 }
  0xee   : > { %v793_v12 = vsub.f32 0.0, %v585_v60  ;;  %v601_v19 = vmul.f32 0.3275911, %v585_v60  ;;  %1608 = vrcp.f32 %v616_v7  ;;  %v2146_v39 = vsel %vm553_vm4, 1.0, %v2499_v52 }
  0xef   : > { %v475_v63 = vpop.f32.mrf.mxu0  ;;  %v693_v16 = vadd.f32 1.4214138, %v677_v0  ;;  %v602_v22 = vmul.f32 0.3275911, %v586_v9  ;;  %v794_v23 = vsub.f32 0.0, %v586_v9  ;;  %1610 = vpow2.f32 %v825_v14 }
  0xf0   : > { %v2107_v2 = vpop.eup %1600  ;;  %v476_v5 = vadd.f32 %v475_v63, %v2065_v1  ;;  %v504_v6 = vpop.f32.mrf.mxu1  ;;  %v809_v25 = vmul.f32 %v793_v12, %v585_v60  ;;  %v617_v33 = vadd.f32 1.0, %v601_v19  ;;  %1612 = vpow2.f32 %v827_v21 }
  0xf1   : > { %v647_v10 = vmul.f32 1.0614054, %v2107_v2  ;;  %v505_v13 = vadd.f32 %v504_v6, %v2067_v3  ;;  %v2126_v24 = vpop.eup %1602  ;;  %v709_v31 = vmul.f32 %v2078_v34, %v693_v16  ;;  %v618_v40 = vadd.f32 1.0, %v602_v22 }
  0xf2   : > { %v2119_v15 = vmul.f32 0.70710677, %v476_v5  ;;  %v2137_v32 = vpop.eup %1604  ;;  %v810_v41 = vmul.f32 %v794_v23, %v586_v9  ;;  %v829_v44 = vmul.f32 1.442695, %v809_v25  ;;  %v2153_v46 = vmul.f32 1.0614054, %v2126_v24 }
  0xf3   : > { %v663_v20 = vadd.f32 -1.4531521, %v647_v10  ;;  %v2129_v26 = vmul.f32 0.70710677, %v505_v13  ;;  %v2141_v38 = vpop.eup %1606  ;;  %v2158_v50 = vsel %vm554_vm5, 1.0, %v2499_v52  ;;  %1614 = vrcp.f32 %v617_v33 }
  0xf4   : > { %v587_v29 = vand.u32 2147483647, %v2119_v15  ;;  %v2155_v49 = vpop.eup %1608  ;;  %v725_v54 = vadd.f32 -0.28449672, %v709_v31  ;;  %v2160_v55 = vmul.f32 0.5, %v476_v5  ;;  %1616 = vrcp.f32 %v618_v40 }
  0xf5   : > { %v679_v27 = vmul.f32 %v2107_v2, %v663_v20  ;;  %v588_v45 = vand.u32 2147483647, %v2129_v26  ;;  %v2163_v60 = vpop.eup %1610  ;;  %v831_v61 = vmul.f32 1.442695, %v810_v41  ;;  %v2165_v62 = vmul.f32 0.5, %v505_v13 }
  0xf6   : > { %v795_v43 = vsub.f32 0.0, %v587_v29  ;;  %v603_v56 = vmul.f32 0.3275911, %v587_v29  ;;  %vm555_vm6 = vcmp.ge.f32.partialorder %v2119_v15, 0.0  ;;  %1618 = vpow2.f32 %v829_v44  ;;  %v2172_v12 = vpop.eup %1612 }
  0xf7   : > { %v478_v30 = vpop.f32.mrf.mxu0  ;;  %v695_v37 = vadd.f32 1.4214138, %v679_v27  ;;  %v604_v0 = vmul.f32 0.3275911, %v588_v45  ;;  %v796_v6 = vsub.f32 0.0, %v588_v45  ;;  %v741_v10 = vmul.f32 %v2078_v34, %v725_v54 }
  0xf8   : > { %v479_v35 = vadd.f32 %v478_v30, %v2065_v1  ;;  %v507_v36 = vpop.f32.mrf.mxu1  ;;  %v811_v5 = vmul.f32 %v795_v43, %v587_v29  ;;  %v619_v14 = vadd.f32 1.0, %v603_v56  ;;  %vm556_vm7 = vcmp.ge.f32.partialorder %v2129_v26, 0.0 }
  0xf9   : > { %v2149_v42 = vadd.f32 %v507_v36, %v2067_v3  ;;  %v711_v57 = vmul.f32 %v2107_v2, %v695_v37  ;;  %1620 = vpow2.f32 %v831_v61  ;;  %v2182_v20 = vsel %vm555_vm6, 1.0, %v2499_v52  ;;  %v2188_v23 = vpop.eup %1614 }
  0xfa   : > { %v541_v51 = vmul.f32 0.70710677, %v479_v35  ;;  %v620_v25 = vadd.f32 1.0, %v604_v0  ;;  %v812_v26 = vmul.f32 %v796_v6, %v588_v45  ;;  %v757_v29 = vadd.f32 0.2548296, %v741_v10  ;;  %v2193_v30 = vpop.eup %1616 }
  0xfb   : > { %2527 = vst [vmem:[#allocation16_spill] sm:$0xff] %v2149_v42  ;;  %v2168_v63 = vmul.f32 0.70710677, %v2149_v42  ;;  %v727_v7 = vadd.f32 -0.28449672, %v711_v57  ;;  %v2196_v15 = vsel %vm556_vm7, 1.0, %v2499_v52  ;;  %1622 = vrcp.f32 %v619_v14 }
  0xfc   : > { %v589_v8 = vand.u32 2147483647, %v541_v51  ;;  %v833_v31 = vmul.f32 1.442695, %v811_v5  ;;  %v2201_v37 = vmul.f32 0.5, %v479_v35  ;;  %v2206_v44 = vpop.eup %1618  ;;  %vm557_vm8 = vcmp.ge.f32.partialorder %v541_v51, 0.0 }
  0xfd   : > { %v743_v19 = vmul.f32 %v2107_v2, %v727_v7  ;;  %v590_v21 = vand.u32 2147483647, %v2168_v63  ;;  %v2204_v41 = vmul.f32 1.0614054, %v2155_v49  ;;  %1624 = vrcp.f32 %v620_v25 }
  0xfe   : > { %v797_v33 = vsub.f32 0.0, %v589_v8  ;;  %v605_v45 = vmul.f32 0.3275911, %v589_v8  ;;  %v835_v56 = vmul.f32 1.442695, %v812_v26  ;;  %v773_v61 = vmul.f32 %v2078_v34, %v757_v29 }
  0xff   : > { %v480_v9 = vpop.f32.mrf.mxu0  ;;  %v759_v40 = vadd.f32 0.2548296, %v743_v19  ;;  %v798_v43 = vsub.f32 0.0, %v590_v21  ;;  %v606_v57 = vmul.f32 0.3275911, %v590_v21  ;;  %v2210_v0 = vpop.eup %1620  ;;  %1626 = vpow2.f32 %v833_v31 }
 0x100   : > { %v2176_v13 = vadd.f32 %v480_v9, %v2065_v1  ;;  %v509_v16 = vpop.f32.mrf.mxu1  ;;  %v813_v35 = vmul.f32 %v797_v33, %v589_v8  ;;  %v2215_v51 = vsel %vm557_vm8, 1.0, %v2499_v52  ;;  %vm558_vm9 = vcmp.ge.f32.partialorder %v2168_v63, 0.0 }
 0x101   : > { %v2186_v22 = vadd.f32 %v509_v16, %v2067_v3  ;;  %v775_v5 = vmul.f32 %v2107_v2, %v759_v40  ;;  %v853_v34 = vmul.f32 %v2137_v32, %v773_v61  ;;  %v621_v14 = vadd.f32 1.0, %v605_v45  ;;  %v2225_v25 = vpop.eup %1622 }
 0x102   : > { %v2191_v27 = vmul.f32 0.70710677, %v2176_v13  ;;  %v814_v16 = vmul.f32 %v798_v43, %v590_v21  ;;  %v622_v2 = vadd.f32 1.0, %v606_v57  ;;  %1628 = vpow2.f32 %v835_v56 }
 0x103   : > { %2528 = vst [vmem:[#allocation17_spill] sm:$0xff] %v2186_v22  ;;  %v2199_v36 = vmul.f32 0.70710677, %v2186_v22  ;;  %v855_v31 = vmul.f32 %v2163_v60, %v775_v5  ;;  %v837_v33 = vmul.f32 1.442695, %v813_v35  ;;  %v2234_v21 = vpop.eup %1624  ;;  %v2239_v45 = vsel %vm558_vm9, 1.0, %v2499_v52 }
 0x104   : > { %v591_v54 = vand.u32 2147483647, %v2191_v27  ;;  %2533 = vst [vmem:[#allocation22_spill] sm:$0xff] %v2239_v45  ;;  %v869_v57 = vsub.f32 1.0, %v853_v34  ;;  %v662_v61 = vadd.f32 -1.4531521, %v2153_v46  ;;  %1630 = vrcp.f32 %v621_v14 }
 0x105   : > { %v592_v6 = vand.u32 2147483647, %v2199_v36  ;;  %v839_v60 = vmul.f32 1.442695, %v814_v16  ;;  %1632 = vrcp.f32 %v622_v2  ;;  %v2247_v63 = vmul.f32 0.5, %v2176_v13 }
 0x106   : > { %v799_v19 = vsub.f32 0.0, %v591_v54  ;;  %v607_v26 = vmul.f32 0.3275911, %v591_v54  ;;  %1634 = vpow2.f32 %v837_v33  ;;  %v885_v46 = vmul.f32 %v869_v57, %v2093_v53 }
 0x107   : > { %v483_v7 = vpop.f32.mrf.mxu0  ;;  %v608_v40 = vmul.f32 0.3275911, %v592_v6  ;;  %v800_v43 = vsub.f32 0.0, %v592_v6  ;;  %vm559_vm10 = vcmp.ge.f32.partialorder %v2191_v27, 0.0  ;;  %1636 = vpow2.f32 %v839_v60 }
 0x108   : > { %v2219_v9 = vadd.f32 %v483_v7, %v2065_v1  ;;  %v512_v10 = vpop.f32.mrf.mxu1  ;;  %v2242_v7 = vpop.eup %1626  ;;  %v815_v56 = vmul.f32 %v799_v19, %v591_v54  ;;  %v623_v5 = vadd.f32 1.0, %v607_v26  ;;  %vm560_vm11 = vcmp.ge.f32.partialorder %v2199_v36, 0.0 }
 0x109   : > { %v2223_v8 = vadd.f32 %v512_v10, %v2067_v3  ;;  %v624_v52 = vadd.f32 1.0, %v608_v40  ;;  %v816_v14 = vmul.f32 %v800_v43, %v592_v6  ;;  %v2255_v2 = vpop.eup %1628 }
 0x10a   : > { %2529 = vst [vmem:[#allocation18_spill] sm:$0xff] %v2219_v9  ;;  %v2228_v29 = vmul.f32 0.70710677, %v2219_v9  ;;  %v841_v26 = vmul.f32 1.442695, %v815_v56  ;;  %1638 = vrcp.f32 %v623_v5  ;;  %v2263_v6 = vpop.eup %1630  ;;  %v678_v56 = vmul.f32 %v2126_v24, %v662_v61 }
 0x10b   : > { %2530 = vst [vmem:[#allocation19_spill] sm:$0xff] %v2223_v8  ;;  %v2232_v32 = vmul.f32 0.70710677, %v2223_v8  ;;  %v871_v8 = vsub.f32 1.0, %v855_v31  ;;  %1640 = vrcp.f32 %v624_v52  ;;  %v2269_v43 = vpop.eup %1632  ;;  %v843_v57 = vmul.f32 1.442695, %v816_v14 }
 0x10c   : > { %2531 = vst [vmem:[#allocation20_spill] sm:$0xff] %v2228_v29  ;;  %v593_v35 = vand.u32 2147483647, %v2228_v29  ;;  %v2275_v5 = vpop.eup %1634  ;;  %1642 = vpow2.f32 %v841_v26 }
 0x10d   : > { %2532 = vst [vmem:[#allocation21_spill] sm:$0xff] %v2232_v32  ;;  %v594_v10 = vand.u32 2147483647, %v2232_v32  ;;  %v887_v19 = vmul.f32 %v871_v8, %v2116_v11  ;;  %v901_v11 = vadd.f32 1.0, %v885_v46  ;;  %v664_v8 = vadd.f32 -1.4531521, %v2204_v41 }
 0x10e   : > { %v609_v31 = vmul.f32 0.3275911, %v593_v35  ;;  %v801_v33 = vsub.f32 0.0, %v593_v35  ;;  %1644 = vpow2.f32 %v843_v57 }
 0x10f   : > { %v485_v34 = vpop.f32.mrf.mxu0  ;;  %v610_v53 = vmul.f32 0.3275911, %v594_v10  ;;  %v903_v60 = vadd.f32 1.0, %v887_v19  ;;  %v802_v46 = vsub.f32 0.0, %v594_v10  ;;  %v2286_v19 = vpop.eup %1636  ;;  %v680_v32 = vmul.f32 %v2155_v49, %v664_v8 }
 0x110   : > { %v2252_v54 = vadd.f32 %v485_v34, %v2065_v1  ;;  %v514_v16 = vpop.f32.mrf.mxu1  ;;  %v2538_v34 = vmov -1.0   ;;  %v817_v14 = vmul.f32 %v801_v33, %v593_v35  ;;  %v2292_v26 = vpop.eup %1638  ;;  %v649_v35 = vmul.f32 1.0614054, %v2188_v23 }
 0x111   : > { %v2258_v13 = vadd.f32 %v514_v16, %v2067_v3  ;;  %v2280_v52 = vsel %vm559_vm10, 1.0, %v2538_v34  ;;  %v625_v16 = vadd.f32 1.0, %v609_v31  ;;  %v919_v27 = vmul.f32 %v903_v60, %v2102_v59  ;;  %v2295_v31 = vpop.eup %1640 }
 0x112   : > { %2534 = vst [vmem:[#allocation23_spill] sm:$0xff] %v2252_v54  ;;  %v2261_v40 = vmul.f32 0.70710677, %v2252_v54  ;;  %v917_v54 = vmul.f32 %v901_v11, %v2088_v47  ;;  %v2297_v33 = vmul.f32 %v802_v46, %v594_v10  ;;  %v696_v29 = vadd.f32 1.4214138, %v680_v32  ;;  %v2303_v8 = vpop.eup %1642 }
 0x113   : > { %2535 = vst [vmem:[#allocation24_spill] sm:$0xff] %v2258_v13  ;;  %v2266_v1 = vmul.f32 0.70710677, %v2258_v13  ;;  %v626_v13 = vadd.f32 1.0, %v610_v53  ;;  %1646 = vrcp.f32 %v625_v16  ;;  %v2299_v47 = vmul.f32 1.442695, %v817_v14 }
 0x114   : > { %2536 = vst [vmem:[#allocation25_spill] sm:$0xff] %v2261_v40  ;;  %v2272_v3 = vand.u32 2147483647, %v2261_v40  ;;  %v694_v40 = vadd.f32 1.4214138, %v678_v56  ;;  %v941_v42 = vpack.c.bf16 %v919_v27, %v917_v54  ;;  %v712_v57 = vmul.f32 %v2155_v49, %v696_v29  ;;  %v2310_v16 = vpop.eup %1644 }
 0x115   : > { %2537 = vst [vmem:[#allocation26_spill] sm:$0xff] %v2266_v1  ;;  %v2283_v41 = vand.u32 2147483647, %v2266_v1  ;;  %v651_v11 = vmul.f32 1.0614054, %v2225_v25  ;;  %1648 = vrcp.f32 %v626_v13 }
 0x116   : > { %v611_v9 = vmul.f32 0.3275911, %v2272_v3  ;;  %v710_v59 = vmul.f32 %v2126_v24, %v694_v40  ;;  %1085 = vmatmul.bf16.vlgmr.msra.gmra.mxu2 %v941_v42  ;;  %v665_v10 = vadd.f32 -1.4531521, %v649_v35  ;;  %v650_v32 = vmul.f32 1.0614054, %v2193_v30 }
 0x117   : > { %v612_v61 = vmul.f32 0.3275911, %v2283_v41  ;;  %v667_v54 = vadd.f32 -1.4531521, %v651_v11  ;;  %v728_v56 = vadd.f32 -0.28449672, %v712_v57 }
 0x118   : > { %v627_v1 = vadd.f32 1.0, %v611_v9  ;;  %v726_v60 = vadd.f32 -0.28449672, %v710_v59  ;;  %v681_v40 = vmul.f32 %v2188_v23, %v665_v10  ;;  %v652_v46 = vmul.f32 1.0614054, %v2234_v21  ;;  %2539 = vst [vmem:[#allocation27_spill] sm:$0xff] %v2310_v16 }
 0x119   : > { %v628_v53 = vadd.f32 1.0, %v612_v61  ;;  %v683_v42 = vmul.f32 %v2225_v25, %v667_v54  ;;  %v666_v14 = vadd.f32 -1.4531521, %v650_v32  ;;  %v653_v29 = vmul.f32 1.0614054, %v2263_v6 }
 0x11a   : > { %1650 = vrcp.f32 %v627_v1  ;;  %v742_v13 = vmul.f32 %v2126_v24, %v726_v60  ;;  %v744_v1 = vmul.f32 %v2155_v49, %v728_v56  ;;  %v697_v61 = vadd.f32 1.4214138, %v681_v40 }
 0x11b   : > { %1652 = vrcp.f32 %v628_v53  ;;  %v668_v27 = vadd.f32 -1.4531521, %v652_v46  ;;  %v655_v35 = vmul.f32 1.0614054, %v2292_v26  ;;  %v2317_v53 = vpop.eup %1646  ;;  %v699_v11 = vadd.f32 1.4214138, %v683_v42 }
 0x11c   : > { %v758_v59 = vadd.f32 0.2548296, %v742_v13  ;;  %v682_v57 = vmul.f32 %v2193_v30, %v666_v14  ;;  %v669_v10 = vadd.f32 -1.4531521, %v653_v29  ;;  %v2320_v9 = vpop.eup %1648  ;;  %v760_v60 = vadd.f32 0.2548296, %v744_v1 }
 0x11d   : > { %v713_v54 = vmul.f32 %v2188_v23, %v697_v61  ;;  %v684_v32 = vmul.f32 %v2234_v21, %v668_v27  ;;  %v671_v22 = vadd.f32 -1.4531521, %v655_v35  ;;  %v715_v46 = vmul.f32 %v2225_v25, %v699_v11 }
 0x11e   : > { %v774_v40 = vmul.f32 %v2126_v24, %v758_v59  ;;  %v698_v45 = vadd.f32 1.4214138, %v682_v57  ;;  %v685_v13 = vmul.f32 %v2263_v6, %v669_v10  ;;  %v776_v14 = vmul.f32 %v2155_v49, %v760_v60 }
 0x11f   : > { %v729_v29 = vadd.f32 -0.28449672, %v713_v54  ;;  %v700_v1 = vadd.f32 1.4214138, %v684_v32  ;;  %v687_v61 = vmul.f32 %v2292_v26, %v671_v22  ;;  %v731_v35 = vadd.f32 -0.28449672, %v715_v46 }
 0x120   : > { %v2324_v56 = vpop.eup %1650  ;;  %v854_v27 = vmul.f32 %v2141_v38, %v774_v40  ;;  %v714_v34 = vmul.f32 %v2193_v30, %v698_v45  ;;  %v701_v16 = vadd.f32 1.4214138, %v685_v13  ;;  %v856_v24 = vmul.f32 %v2172_v12, %v776_v14 }
 0x121   : > { %v2329_v42 = vpop.eup %1652  ;;  %v745_v59 = vmul.f32 %v2188_v23, %v729_v29  ;;  %v716_v11 = vmul.f32 %v2234_v21, %v700_v1  ;;  %v703_v57 = vadd.f32 1.4214138, %v687_v61  ;;  %v747_v49 = vmul.f32 %v2225_v25, %v731_v35 }
 0x122   : > { %v870_v10 = vsub.f32 1.0, %v854_v27  ;;  %v730_v60 = vadd.f32 -0.28449672, %v714_v34  ;;  %v717_v54 = vmul.f32 %v2263_v6, %v701_v16  ;;  %v872_v22 = vsub.f32 1.0, %v856_v24 }
 0x123   : > { %v761_v32 = vadd.f32 0.2548296, %v745_v59  ;;  %v732_v38 = vadd.f32 -0.28449672, %v716_v11  ;;  %v719_v40 = vmul.f32 %v2292_v26, %v703_v57  ;;  %v763_v46 = vadd.f32 0.2548296, %v747_v49 }
 0x124   : > { %v886_v45 = vmul.f32 %v870_v10, %v2100_v58  ;;  %v746_v12 = vmul.f32 %v2193_v30, %v730_v60  ;;  %v733_v13 = vadd.f32 -0.28449672, %v717_v54  ;;  %v888_v14 = vmul.f32 %v872_v22, %v2122_v17 }
 0x125   : > { %v777_v29 = vmul.f32 %v2188_v23, %v761_v32  ;;  %v748_v1 = vmul.f32 %v2234_v21, %v732_v38  ;;  %v735_v34 = vadd.f32 -0.28449672, %v719_v40  ;;  %v779_v16 = vmul.f32 %v2225_v25, %v763_v46 }
 0x126   : > { %v902_v61 = vadd.f32 1.0, %v886_v45  ;;  %v762_v27 = vadd.f32 0.2548296, %v746_v12  ;;  %v749_v35 = vmul.f32 %v2263_v6, %v733_v13  ;;  %v904_v24 = vadd.f32 1.0, %v888_v14 }
 0x127   : > { %v857_v58 = vmul.f32 %v2206_v44, %v777_v29  ;;  %v764_v59 = vadd.f32 0.2548296, %v748_v1  ;;  %v751_v11 = vmul.f32 %v2292_v26, %v735_v34  ;;  %v859_v17 = vmul.f32 %v2242_v7, %v779_v16 }
 0x128   : > { %v918_v57 = vmul.f32 %v902_v61, %v2090_v48  ;;  %v778_v23 = vmul.f32 %v2193_v30, %v762_v27  ;;  %v765_v10 = vadd.f32 0.2548296, %v749_v35  ;;  %v920_v49 = vmul.f32 %v904_v24, %v2109_v4 }
 0x129   : > { %v873_v60 = vsub.f32 1.0, %v857_v58  ;;  %v780_v25 = vmul.f32 %v2234_v21, %v764_v59  ;;  %v767_v54 = vadd.f32 0.2548296, %v751_v11  ;;  %v875_v22 = vsub.f32 1.0, %v859_v17 }
 0x12a   : > { %v858_v32 = vmul.f32 %v2210_v0, %v778_v23  ;;  %v781_v44 = vmul.f32 %v2263_v6, %v765_v10  ;;  %v654_v38 = vmul.f32 1.0614054, %v2269_v43  ;;  %v942_v40 = vpack.c.bf16 %v920_v49, %v918_v57 }
 0x12b   : > { %v889_v48 = vmul.f32 %v873_v60, %v2146_v39  ;;  %v860_v7 = vmul.f32 %v2255_v2, %v780_v25  ;;  %v783_v30 = vmul.f32 %v2292_v26, %v767_v54  ;;  %v891_v4 = vmul.f32 %v875_v22, %v2182_v20 }
 0x12c   : > { %v874_v45 = vsub.f32 1.0, %v858_v32  ;;  %v861_v21 = vmul.f32 %v2275_v5, %v781_v44  ;;  %v656_v46 = vmul.f32 1.0614054, %v2295_v31  ;;  %1114 = vmatmul.bf16.vlgmr.msra.gmra.mxu3 %v942_v40  ;;  %v670_v13 = vadd.f32 -1.4531521, %v654_v38 }
 0x12d   : > { %v905_v0 = vadd.f32 1.0, %v889_v48  ;;  %v876_v12 = vsub.f32 1.0, %v860_v7  ;;  %v863_v6 = vmul.f32 %v2303_v8, %v783_v30  ;;  %v2366_v14 = vmul.f32 1.442695, %v2297_v33 }
 0x12e   : > { %v804_v39 = vsub.f32 0.0, %v2283_v41  ;;  %v907_v2 = vadd.f32 1.0, %v891_v4  ;;  %v672_v26 = vadd.f32 -1.4531521, %v656_v46  ;;  %v890_v20 = vmul.f32 %v874_v45, %v2158_v50 }
 0x12f   : > { %v892_v29 = vmul.f32 %v876_v12, %v2196_v15  ;;  %v879_v5 = vsub.f32 1.0, %v863_v6  ;;  %v686_v1 = vmul.f32 %v2269_v43, %v670_v13  ;;  %v2540_v34 = vsub.f32 0.0, %v2272_v3 }
 0x130   : > { %v921_v8 = vmul.f32 %v905_v0, %v2124_v18  ;;  %v923_v33 = vmul.f32 %v907_v2, %v2160_v55  ;;  %v688_v16 = vmul.f32 %v2295_v31, %v672_v26  ;;  %v877_v35 = vsub.f32 1.0, %v861_v21 }
 0x131   : > { %v819_v61 = vmul.f32 %v2540_v34, %v2272_v3  ;;  %v908_v27 = vadd.f32 1.0, %v892_v29  ;;  %v702_v24 = vadd.f32 1.4214138, %v686_v1  ;;  %v657_v50 = vmul.f32 1.0614054, %v2317_v53 }
 0x132   : > { %1654 = vpow2.f32 %v2299_v47  ;;  %v820_v15 = vmul.f32 %v804_v39, %v2283_v41  ;;  %v943_v58 = vpack.c.bf16 %v923_v33, %v921_v8  ;;  %v704_v59 = vadd.f32 1.4214138, %v688_v16  ;;  %v2541_v33 = vld [vmem:[#allocation27_spill] sm:$0xff] }
 0x133   : > { %v906_v11 = vadd.f32 1.0, %v890_v20  ;;  %v895_v3 = vmul.f32 %v879_v5, %v2280_v52  ;;  %v718_v18 = vmul.f32 %v2269_v43, %v702_v24  ;;  %v659_v55 = vmul.f32 1.0614054, %v2324_v56 }
 0x134   : > { %v849_v57 = vmul.f32 1.442695, %v819_v61  ;;  %1090 = vmatmul.bf16.gmra.mxu2 %v943_v58  ;;  %v720_v17 = vmul.f32 %v2295_v31, %v704_v59  ;;  %v673_v23 = vadd.f32 -1.4531521, %v657_v50  ;;  %v658_v10 = vmul.f32 1.0614054, %v2320_v9 }
 0x135   : > { %v924_v47 = vmul.f32 %v908_v27, %v2165_v62  ;;  %v893_v41 = vmul.f32 %v877_v35, %v2215_v51  ;;  %v734_v49 = vadd.f32 -0.28449672, %v718_v18  ;;  %v675_v60 = vadd.f32 -1.4531521, %v659_v55 }
 0x136   : > { %v736_v52 = vadd.f32 -0.28449672, %v720_v17  ;;  %v689_v25 = vmul.f32 %v2317_v53, %v673_v23  ;;  %v660_v54 = vmul.f32 1.0614054, %v2329_v42  ;;  %v674_v22 = vadd.f32 -1.4531521, %v658_v10 }
 0x137   : > { %v922_v32 = vmul.f32 %v906_v11, %v2133_v28  ;;  %v911_v44 = vadd.f32 1.0, %v895_v3  ;;  %v750_v38 = vmul.f32 %v2269_v43, %v734_v49  ;;  %v691_v40 = vmul.f32 %v2324_v56, %v675_v60  ;;  %v2543_v11 = vld [vmem:[#allocation22_spill] sm:$0xff]  ;;  %v2544_v10 = vld [vmem:[#allocation17_spill] sm:$0xff] }
 0x138   : > { %v1655_v62 = vpop.eup %1654  ;;  %v752_v51 = vmul.f32 %v2295_v31, %v736_v52  ;;  %v705_v48 = vadd.f32 1.4214138, %v689_v25  ;;  %v676_v7 = vadd.f32 -1.4531521, %v660_v54  ;;  %v690_v30 = vmul.f32 %v2320_v9, %v674_v22 }
 0x139   : > { %v944_v4 = vpack.c.bf16 %v924_v47, %v922_v32  ;;  %v909_v45 = vadd.f32 1.0, %v893_v41  ;;  %v766_v21 = vadd.f32 0.2548296, %v750_v38  ;;  %v707_v46 = vadd.f32 1.4214138, %v691_v40  ;;  %v2545_v41 = vld [vmem:[#allocation20_spill] sm:$0xff] }
 0x13a   : > { %v768_v0 = vadd.f32 0.2548296, %v752_v51  ;;  %v721_v12 = vmul.f32 %v2317_v53, %v705_v48  ;;  %v692_v28 = vmul.f32 %v2329_v42, %v676_v7  ;;  %v706_v6 = vadd.f32 1.4214138, %v690_v30  ;;  %v2546_v32 = vld [vmem:[#allocation16_spill] sm:$0xff] }
 0x13b   : > { %v851_v13 = vmul.f32 1.442695, %v820_v15  ;;  %v927_v39 = vmul.f32 %v911_v44, %v2247_v63  ;;  %v782_v2 = vmul.f32 %v2269_v43, %v766_v21  ;;  %v723_v26 = vmul.f32 %v2324_v56, %v707_v46  ;;  %v2547_v44 = vld [vmem:[#allocation25_spill] sm:$0xff]  ;;  %v2548_v46 = vld [vmem:[#allocation26_spill] sm:$0xff] }
 0x13c   : > { %v784_v20 = vmul.f32 %v2295_v31, %v768_v0  ;;  %v737_v29 = vadd.f32 -0.28449672, %v721_v12  ;;  %v708_v5 = vadd.f32 1.4214138, %v692_v28  ;;  %v722_v1 = vmul.f32 %v2320_v9, %v706_v6  ;;  %1119 = vmatmul.bf16.gmra.mxu3 %v944_v4 }
 0x13d   : > { %1656 = vpow2.f32 %v849_v57  ;;  %v925_v34 = vmul.f32 %v909_v45, %v2201_v37  ;;  %v862_v61 = vmul.f32 %v2286_v19, %v782_v2  ;;  %v739_v8 = vadd.f32 -0.28449672, %v723_v26 }
 0x13e   : > { %v864_v16 = vmul.f32 %v2541_v33, %v784_v20  ;;  %v753_v63 = vmul.f32 %v2317_v53, %v737_v29  ;;  %v724_v43 = vmul.f32 %v2329_v42, %v708_v5  ;;  %v738_v27 = vadd.f32 -0.28449672, %v722_v1  ;;  %v2551_v20 = vld [vmem:[#allocation18_spill] sm:$0xff] }
 0x13f   : > { %1658 = vpow2.f32 %v2366_v14  ;;  %v945_v31 = vpack.c.bf16 %v927_v39, %v925_v34  ;;  %v878_v35 = vsub.f32 1.0, %v862_v61  ;;  %v755_v24 = vmul.f32 %v2324_v56, %v739_v8 }
 0x140   : > { %v880_v50 = vsub.f32 1.0, %v864_v16  ;;  %v769_v15 = vadd.f32 0.2548296, %v753_v63  ;;  %v740_v58 = vadd.f32 -0.28449672, %v724_v43  ;;  %v754_v37 = vmul.f32 %v2320_v9, %v738_v27  ;;  %v2552_v43 = vld [vmem:[#allocation24_spill] sm:$0xff] }
 0x141   : > { %v2542_v19 = vmov -1.0   ;;  %1660 = vpow2.f32 %v851_v13  ;;  %v894_v3 = vmul.f32 %v878_v35, %v2543_v11  ;;  %v771_v18 = vadd.f32 0.2548296, %v755_v24  ;;  %v2549_v13 = vld [vmem:[#allocation21_spill] sm:$0xff]  ;;  %v2553_v35 = vld [vmem:[#allocation19_spill] sm:$0xff] }
 0x142   : > { %v576_v59 = vsel %vm560_vm11, 1.0, %v2542_v19  ;;  %v785_v14 = vmul.f32 %v2317_v53, %v769_v15  ;;  %v756_v57 = vmul.f32 %v2329_v42, %v740_v58  ;;  %v770_v17 = vadd.f32 0.2548296, %v754_v37 }
 0x143   : > { %v896_v55 = vmul.f32 %v880_v50, %v576_v59  ;;  %v1657_v23 = vpop.eup %1656  ;;  %v528_v47 = vmul.f32 0.5, %v2544_v10  ;;  %vm561_vm12 = vcmp.ge.f32.partialorder %v2545_v41, 0.0  ;;  %v910_v49 = vadd.f32 1.0, %v894_v3 }
 0x144   : > { %v787_v60 = vmul.f32 %v2324_v56, %v771_v18  ;;  %1095 = vmatmul.bf16.gmra.mxu2 %v945_v31  ;;  %v865_v52 = vmul.f32 %v1655_v62, %v785_v14  ;;  %v772_v25 = vadd.f32 0.2548296, %v756_v57  ;;  %v786_v54 = vmul.f32 %v2320_v9, %v770_v17 }
 0x145   : > { %v912_v36 = vadd.f32 1.0, %v896_v55  ;;  %v1659_v22 = vpop.eup %1658  ;;  %v526_v53 = vmul.f32 0.5, %v2546_v32  ;;  %vm563_vm13 = vcmp.ge.f32.partialorder %v2547_v44, 0.0  ;;  %v577_v56 = vsel %vm561_vm12, 1.0, %v2542_v19 }
 0x146   : > { %v867_v38 = vmul.f32 %v1657_v23, %v787_v60  ;;  %v881_v51 = vsub.f32 1.0, %v865_v52  ;;  %v788_v48 = vmul.f32 %v2329_v42, %v772_v25  ;;  %v866_v4 = vmul.f32 %v1659_v22, %v786_v54  ;;  %v2550_v42 = vld [vmem:[#allocation23_spill] sm:$0xff] }
 0x147   : > { %v928_v40 = vmul.f32 %v912_v36, %v528_v47  ;;  %v1661_v7 = vpop.eup %1660  ;;  %v926_v30 = vmul.f32 %v910_v49, %v526_v53  ;;  %v579_v9 = vsel %vm563_vm13, 1.0, %v2542_v19  ;;  %vm564_vm14 = vcmp.ge.f32.partialorder %v2548_v46, 0.0 }
 0x148   : > { %v883_v62 = vsub.f32 1.0, %v867_v38  ;;  %v897_v45 = vmul.f32 %v881_v51, %v577_v56  ;;  %v868_v21 = vmul.f32 %v1661_v7, %v788_v48  ;;  %vm562_vm15 = vcmp.ge.f32.partialorder %v2549_v13, 0.0 }
 0x149   : > { %v946_v0 = vpack.c.bf16 %v928_v40, %v926_v30  ;;  %v531_v39 = vmul.f32 0.5, %v2550_v42  ;;  %v882_v26 = vsub.f32 1.0, %v866_v4  ;;  %v529_v29 = vmul.f32 0.5, %v2551_v20 }
 0x14a   : > { %v899_v12 = vmul.f32 %v883_v62, %v579_v9  ;;  %v913_v28 = vadd.f32 1.0, %v897_v45  ;;  %v884_v6 = vsub.f32 1.0, %v868_v21  ;;  %v580_v5 = vsel %vm564_vm14, 1.0, %v2542_v19 }
 0x14b   : > { %v578_v61 = vsel %vm562_vm15, 1.0, %v2542_v19  ;;  %v532_v27 = vmul.f32 0.5, %v2552_v43  ;;  %v530_v24 = vmul.f32 0.5, %v2553_v35  ;;  %v1597_v19 = vld [vmem:[%s2494_s4] ss:$0 sm:$0xff] }
 0x14c   : > { %v915_v2 = vadd.f32 1.0, %v899_v12  ;;  %1124 = vmatmul.bf16.gmra.mxu3 %v946_v0  ;;  %v900_v34 = vmul.f32 %v884_v6, %v580_v5  ;;  %v929_v8 = vmul.f32 %v913_v28, %v529_v29  ;;  %v898_v33 = vmul.f32 %v882_v26, %v578_v61 }
 0x14e   : > { %v931_v1 = vmul.f32 %v915_v2, %v531_v39  ;;  %v916_v63 = vadd.f32 1.0, %v900_v34  ;;  %v914_v31 = vadd.f32 1.0, %v898_v33 }
 0x150   : > { %v947_v16 = vpack.c.bf16 %v931_v1, %v929_v8  ;;  %v932_v50 = vmul.f32 %v916_v63, %v532_v27  ;;  %v930_v15 = vmul.f32 %v914_v31, %v530_v24 }
 0x152   : > { %v948_v58 = vpack.c.bf16 %v932_v50, %v930_v15 }
 0x154   : > { %1100 = vmatmul.bf16.gmra.mxu2 %v947_v16 }
 0x15c   : > { %1129 = vmatmul.bf16.gmra.mxu3 %v948_v58 }
 0x199   : > { %v1086_v37 = vpop.f32.mrf.mxu2 }
 0x1a1   : > { %v1088_v59 = vpop.f32.mrf.mxu2 }
 0x1af   : > { %v1115_v11 = vpop.f32.mrf.mxu3 }
 0x1b0   : > { %v1116_v3 = vadd.f32 %v1115_v11, %v1086_v37 }
 0x1b2   : > { %v1166_v18 = vadd.f32 %v1597_v19, %v1116_v3 }
 0x1b4   : > { %1174 = vst [vmem:[%s2441_s3] sm:$0xff] %v1166_v18 }
 0x1b7   : > { %v1091_v55 = vpop.f32.mrf.mxu2  ;;  %v1117_v14 = vpop.f32.mrf.mxu3 }
 0x1b8   : > { %v1118_v57 = vadd.f32 %v1117_v14, %v1088_v59 }
 0x1ba   : > { %v1167_v17 = vadd.f32 %v1597_v19, %v1118_v57 }
 0x1bc   : > { %1175 = vst [vmem:[%s2441_s3 + $0x8] sm:$0xff] %v1167_v17 }
 0x1bf   : > { %v1093_v23 = vpop.f32.mrf.mxu2  ;;  %v1120_v10 = vpop.f32.mrf.mxu3 }
 0x1c0   : > { %v1121_v47 = vadd.f32 %v1120_v10, %v1091_v55 }
 0x1c2   : > { %v1168_v41 = vadd.f32 %v1597_v19, %v1121_v47 }
 0x1c4   : > { %1176 = vst [vmem:[%s2441_s3 + $0x10] sm:$0xff] %v1168_v41 }
 0x1c7   : > { %v1122_v49 = vpop.f32.mrf.mxu3  ;;  %v1096_v60 = vpop.f32.mrf.mxu2 }
 0x1c8   : > { %v1123_v36 = vadd.f32 %v1122_v49, %v1093_v23 }
 0x1ca   : > { %v1169_v52 = vadd.f32 %v1597_v19, %v1123_v36 }
 0x1cc   : > { %1177 = vst [vmem:[%s2441_s3 + $0x18] sm:$0xff] %v1169_v52 }
 0x1cf   : > { %v1125_v25 = vpop.f32.mrf.mxu3  ;;  %v1098_v22 = vpop.f32.mrf.mxu2 }
 0x1d0   : > { %v1126_v54 = vadd.f32 %v1125_v25, %v1096_v60 }
 0x1d2   : > { %v1170_v32 = vadd.f32 %v1597_v19, %v1126_v54 }
 0x1d4   : > { %1178 = vst [vmem:[%s2441_s3 + $0x20] sm:$0xff] %v1170_v32 }
 0x1d7   : > { %v1127_v53 = vpop.f32.mrf.mxu3  ;;  %v1101_v40 = vpop.f32.mrf.mxu2 }
 0x1d8   : > { %v1128_v44 = vadd.f32 %v1127_v53, %v1098_v22 }
 0x1da   : > { %v1171_v38 = vadd.f32 %v1597_v19, %v1128_v44 }
 0x1dc   : > { %1179 = vst [vmem:[%s2441_s3 + $0x28] sm:$0xff] %v1171_v38 }
 0x1df   : > { %v1130_v51 = vpop.f32.mrf.mxu3  ;;  %v1103_v56 = vpop.f32.mrf.mxu2 }
 0x1e0   : > { %v1131_v48 = vadd.f32 %v1130_v51, %v1101_v40 }
 0x1e2   : > { %v1172_v7 = vadd.f32 %v1597_v19, %v1131_v48 }
 0x1e4   : > { %1180 = vst [vmem:[%s2441_s3 + $0x30] sm:$0xff] %v1172_v7 }
 0x1e7   : > { %v1132_v30 = vpop.f32.mrf.mxu3 }
 0x1e8   : > { %v1133_v62 = vadd.f32 %v1132_v30, %v1103_v56 }
 0x1ea   : > { %v1173_v4 = vadd.f32 %v1597_v19, %v1133_v62 }
 0x1ec   : > { %1181 = vst [vmem:[%s2441_s3 + $0x38] sm:$0xff] %v1173_v4 }
 0x1ed   : > { %1809 = shalt.err (!%p1806_p0)
}
 0x1ee   : > { %s1882_s10 = smov 128   ;;  %s1883_s14 = smov 8  }
 0x1ef   : > { %1511 = dma.vmem_to_hbm [thread:$0]  (%p2006_p3), %s1196_s16, 1024, %s1198_s11, %s1183_s6, %s1882_s10, %s1882_s10, %s1883_s14  }
 0x1f0 PF: > { %s1212_s1 = sand.u32 1, %s1852_s18   ;;  %p1528_p5 = pnand %p1320_p11, %p1963_p6 }
 0x1f1   : > { %s1213_s2 = scalar_lea.sflag [#allocation5], %s1212_s1 }
 0x1f2   : > { %p1529_p7 = pneg %p1528_p5 }
 0x1f4   : > { %1847 = dma.done.wait (%p1529_p7), %s1213_s2, 1024  }
 0x1f5   : > { %1849 = vsyncadd (%p1529_p7), %s1213_s2, 4294966272  ;;  %s23_s23 = sadd.s32 1, %s1872_s23   ;;  %s2554_s18 = smov %s1856_s19 }
 0x1f6   : > { %p20_p9 = scmp.ge.s32.totalorder %s23_s23, 4   ;;  %s2555_s19 = smov %s1860_s20 }
 0x1f7   : > { %s2556_s20 = smov %s2022_s27  ;;  %s2557_s21 = smov %s1868_s22 }
 0x1f8   : > { %s2558_s22 = smov %s2560_s17  ;;  %22 = sbr.rel (!%p20_p9) target bundleno = 12 (0xc), region = 108 }
 0x1fd   :  { %1219 = vsyncpa [#allocation4], 1 }
 0x1fe   :  { %1221 = vsyncpa [#allocation4 + $0x1], 1 }
 0x1ff   :  { %1222 = vsyncpa [#allocation7], 1 }
 0x200   :  { %1223 = vsyncpa [#allocation10], 1 }
 0x201   :  { %1224 = vsyncpa [#allocation5], 1 }
 0x202   :  { %1226 = vsyncpa [#allocation5 + $0x1], 1 }

</bundles_post_ra>
